<compile_context>
chip_gen: v7x
topology: tpu7x:2x2x1
jax: 0.10.0
libtpu: 0.0.40
codegen_flags: <defaults>
</compile_context>

<pallas_src>
import math

import jax
import jax.numpy as jnp
from jax.experimental import pallas as pl
from jax.experimental.pallas import tpu as pltpu

EPS = 1e-12          # matches torch.nn.functional.normalize default eps
NEG_BIG = -1e30      # finite "minus infinity" for masked logits (avoids inf-inf NaNs)


def _scoped_vmem_limit():
    """Generation-aware scoped-VMEM budget: ~3/4 of physical VMEM, capped at 96 MiB.
    (v5e/v6e: 128 MiB physical -> 96 MiB; v7x: 64 MiB -> 48 MiB; fallback 48 MiB)."""
    try:
        cap = pltpu.get_tpu_info().vmem_capacity_bytes
    except Exception:
        cap = 64 * 1024 * 1024
    return int(min(cap * 3 // 4, 96 * 1024 * 1024))


_VMEM_LIMIT = _scoped_vmem_limit()
# bigger row tiles on 128-MiB parts (v5e/v6e), smaller on v7x's 64 MiB VMEM
_PROJ_TM_CAP = 512 if _VMEM_LIMIT >= 64 * 1024 * 1024 else 256
_ATTN_TQ_CAP = 256
_ATTN_TK_CAP = 512


def _pick_tile(dim, cap):
    """Largest tile <= cap that divides `dim`: prefers multiples of 128 (MXU / lane
    friendly), then multiples of 8, else falls back to the whole (small) axis."""
    for t in (cap, 1024, 512, 256, 128):
        if t <= cap and t <= dim and dim % t == 0 and t % 128 == 0:
            return t
    for t in (cap, 512, 256, 128, 64, 32, 16, 8):
        if t <= cap and t <= dim and dim % t == 0 and t % 8 == 0:
            return t
    return dim


def _pick_lane_tile(dim, cap):
    """Tile for a LAST (lane) axis: multiple of 128 or the full axis (always legal)."""
    for t in (cap, 1024, 512, 256, 128):
        if t <= cap and t <= dim and dim % t == 0 and t % 128 == 0:
            return t
    return dim


def _attn_seq_tile(n, cap):
    """Tile for the attention sequence axes.  Long sequences snap to a multiple of 128
    (the remainder is padded + masked); short sequences use one whole 8-aligned tile."""
    if n >= 128:
        for t in (cap, 512, 256, 128):
            if t <= cap and t <= n and t % 128 == 0:
                return t
        return 128
    return ((n + 7) // 8) * 8


def _pad_rows(a, multiple):
    pad = (-a.shape[0]) % multiple
    if pad:
        a = jnp.pad(a, ((0, pad), (0, 0)))
    return a


# ---------------------------------------------------------------------------
# One-shot weight prep kernels: hoisted l2norm + bf16 cast (review opt #2/#3).
# ---------------------------------------------------------------------------
def _row_l2norm_bf16_kernel(w_ref, o_ref):
    w = w_ref[...]                                          # f32
    inv = jax.lax.rsqrt(jnp.maximum(jnp.sum(w * w, axis=1, keepdims=True), EPS * EPS))
    o_ref[...] = (w * inv).astype(o_ref.dtype)


def _col_l2norm_bf16_kernel(w_ref, o_ref):
    w = w_ref[...]
    inv = jax.lax.rsqrt(jnp.maximum(jnp.sum(w * w, axis=0, keepdims=True), EPS * EPS))
    o_ref[...] = (w * inv).astype(o_ref.dtype)


def l2norm_rows_bf16(w):
    r, c = w.shape
    tr = _pick_tile(r, 256)
    return pl.pallas_call(
        _row_l2norm_bf16_kernel,
        out_shape=jax.ShapeDtypeStruct((r, c), jnp.bfloat16),
        grid=(r // tr,),
        in_specs=[pl.BlockSpec((tr, c), lambda i: (i, 0))],
        out_specs=pl.BlockSpec((tr, c), lambda i: (i, 0)),
        compiler_params=pltpu.CompilerParams(
            dimension_semantics=("parallel",), vmem_limit_bytes=_VMEM_LIMIT),
    )(w)


def l2norm_cols_bf16(w):
    r, c = w.shape
    tc = _pick_lane_tile(c, 512)
    return pl.pallas_call(
        _col_l2norm_bf16_kernel,
        out_shape=jax.ShapeDtypeStruct((r, c), jnp.bfloat16),
        grid=(c // tc,),
        in_specs=[pl.BlockSpec((r, tc), lambda i: (0, i))],
        out_specs=pl.BlockSpec((r, tc), lambda i: (0, i)),
        compiler_params=pltpu.CompilerParams(
            dimension_semantics=("parallel",), vmem_limit_bytes=_VMEM_LIMIT),
    )(w)


# ---------------------------------------------------------------------------
# Kernel 1: fused Q/K/V projection + per-head l2norm + learned scale (bf16 output).
#   One (tm, dim) x (dim, 3*dim_inner) MXU matmul per row tile; the per-head q/k
#   normalization happens ONCE per token here (review opt #1 / #11).
# ---------------------------------------------------------------------------
def _make_qkv_kernel(heads, dim_head):
    H, dh = heads, dim_head
    di = H * dh

    def kernel(x_ref, w_ref, s_ref, o_ref):
        x = x_ref[...].astype(jnp.bfloat16)                 # (tm, dim) bf16 MXU input
        w = w_ref[...]                                      # (3*di, dim) bf16, pre-normed
        qkv = jax.lax.dot_general(                          # (tm, 3*di), f32 accumulation
            x, w, (((1,), (1,)), ((), ())), preferred_element_type=jnp.float32)

        # q and k halves: per-head l2norm * learned scale (1/sqrt(dh) already folded
        # into the q scale), f32 math, bf16 lane-slice stores.
        # TODO(synk): for dim_head < 128 these are sub-vreg lane slices (per-head
        # relayouts); pack heads or use dim_head >= 128 for production shapes.
        for j in range(2 * H):
            lo = j * dh
            t = qkv[:, lo:lo + dh]
            inv = jax.lax.rsqrt(jnp.maximum(
                jnp.sum(t * t, axis=-1, keepdims=True), EPS * EPS))
            o_ref[:, lo:lo + dh] = (t * inv * s_ref[:, lo:lo + dh]).astype(o_ref.dtype)

        # v third: plain bf16 store
        o_ref[:, 2 * di:3 * di] = qkv[:, 2 * di:3 * di].astype(o_ref.dtype)

    return kernel


def qkv_project(x2d, wqkv_n, qk_scale, *, heads, dim_head, tm):
    m, dim = x2d.shape
    di = heads * dim_head
    return pl.pallas_call(
        _make_qkv_kernel(heads, dim_head),
        out_shape=jax.ShapeDtypeStruct((m, 3 * di), jnp.bfloat16),
        grid=(m // tm,),
        in_specs=[pl.BlockSpec((tm, dim), lambda i: (i, 0)),
                  pl.BlockSpec((3 * di, dim), lambda i: (0, 0)),   # resident bf16 weight
                  pl.BlockSpec((1, 2 * di), lambda i: (0, 0))],    # resident scales
        out_specs=pl.BlockSpec((tm, 3 * di), lambda i: (i, 0)),
        compiler_params=pltpu.CompilerParams(
            dimension_semantics=("parallel",), vmem_limit_bytes=_VMEM_LIMIT),
    )(x2d, wqkv_n, qk_scale)


# ---------------------------------------------------------------------------
# Kernel 2: flash-style attention over pre-normalized bf16 q/k/v.
#   Grid (B, n/tq, n/tk); online-softmax state in VMEM scratch across the
#   "arbitrary" kv axis; padded kv positions masked with a finite -1e30.
# ---------------------------------------------------------------------------
def _make_flash_kernel(heads, dim_head, tk, n_actual, n_pad):
    H, dh = heads, dim_head
    needs_mask = n_pad != n_actual

    def kernel(q_ref, k_ref, v_ref, o_ref, m_sc, l_sc, acc_sc):
        kvi = pl.program_id(2)

        @pl.when(kvi == 0)
        def _init():
            m_sc[...] = jnp.full(m_sc.shape, -jnp.inf, jnp.float32)
            l_sc[...] = jnp.zeros(l_sc.shape, jnp.float32)
            acc_sc[...] = jnp.zeros(acc_sc.shape, jnp.float32)

        q_all = q_ref[0]          # (tq, H*dh) bf16, already l2-normalized + scaled
        k_all = k_ref[0]          # (tk, H*dh) bf16, already l2-normalized + scaled
        v_all = v_ref[0]          # (tk, H*dh) bf16

        if needs_mask:
            col = jax.lax.broadcasted_iota(jnp.int32, (1, tk), 1) + kvi * tk
            valid = col < n_actual

        # TODO(synk): for dim_head < 128 the per-head lane slices below force relayouts;
        # pack two heads per MXU call (2*dh >= 128) for such configs.
        for h in range(H):
            sl = slice(h * dh, (h + 1) * dh)
            s = jax.lax.dot_general(                       # (tq, tk), f32 accumulation
                q_all[:, sl], k_all[:, sl], (((1,), (1,)), ((), ())),
                preferred_element_type=jnp.float32)
            if needs_mask:
                s = jnp.where(valid, s, NEG_BIG)
            m_prev = m_sc[h]
            m_new = jnp.maximum(m_prev, jnp.max(s, axis=-1, keepdims=True))
            alpha = jnp.exp(m_prev - m_new)
            p = jnp.exp(s - m_new)                         # softmax math stays f32 (EUP)
            l_sc[h] = alpha * l_sc[h] + jnp.sum(p, axis=-1, keepdims=True)
            pv = jax.lax.dot_general(                      # (tq, dh)
                p.astype(jnp.bfloat16), v_all[:, sl], (((1,), (0,)), ((), ())),
                preferred_element_type=jnp.float32)
            acc_sc[h] = alpha * acc_sc[h] + pv
            m_sc[h] = m_new

        @pl.when(kvi == pl.num_programs(2) - 1)
        def _final():
            # per-head lane-slice writes into the lane-dense (tq, H*dh) output tile
            for h in range(H):
                inv_l = pl.reciprocal(l_sc[h], approx=True)
                o_ref[0, :, h * dh:(h + 1) * dh] = (acc_sc[h] * inv_l).astype(o_ref.dtype)

    return kernel


def flash_attention(qkv, *, heads, dim_head, tq, tk, n_actual):
    b, n_pad, _ = qkv.shape
    di = heads * dim_head
    q_spec = pl.BlockSpec((1, tq, di), lambda bi, qi, ki: (bi, qi, 0))
    k_spec = pl.BlockSpec((1, tk, di), lambda bi, qi, ki: (bi, ki, 1))
    v_spec = pl.BlockSpec((1, tk, di), lambda bi, qi, ki: (bi, ki, 2))
    o_spec = pl.BlockSpec((1, tq, di), lambda bi, qi, ki: (bi, qi, 0))
    # TODO(synk): add pipeline_mode=pl.Buffered(3) on the k/v specs if profiling on v5e
    # shows exposed kv DMA at the chosen tk.
    return pl.pallas_call(
        _make_flash_kernel(heads, dim_head, tk, n_actual, n_pad),
        out_shape=jax.ShapeDtypeStruct((b, n_pad, di), jnp.bfloat16),
        grid=(b, n_pad // tq, n_pad // tk),
        in_specs=[q_spec, k_spec, v_spec],     # same fused bf16 qkv buffer, 3 lane blocks
        out_specs=o_spec,
        scratch_shapes=[
            pltpu.VMEM((heads, tq, 1), jnp.float32),          # running max
            pltpu.VMEM((heads, tq, 1), jnp.float32),          # running denominator
            pltpu.VMEM((heads, tq, dim_head), jnp.float32),   # output accumulator
        ],
        compiler_params=pltpu.CompilerParams(
            # v7x megacore shards the two "parallel" axes across 2 TCs; keep
            # b * (n_pad // tq) >= 2 (and even) for full utilization.
            dimension_semantics=("parallel", "parallel", "arbitrary"),
            vmem_limit_bytes=_VMEM_LIMIT),
    )(qkv, qkv, qkv)


# ---------------------------------------------------------------------------
# Kernel 3: output NormLinear (weight already col-normalized + bf16 by the prep kernel).
# ---------------------------------------------------------------------------
def _out_proj_kernel(x_ref, w_ref, o_ref):
    x = x_ref[...].astype(jnp.bfloat16)                    # attention output is bf16
    w = w_ref[...]                                         # (dim, di) bf16 pre-normed
    o_ref[...] = jax.lax.dot_general(
        x, w, (((1,), (1,)), ((), ())), preferred_element_type=jnp.float32)


def out_project(x2d, wo_n, *, tm):
    m, di = x2d.shape
    dim = wo_n.shape[0]
    return pl.pallas_call(
        _out_proj_kernel,
        out_shape=jax.ShapeDtypeStruct((m, dim), jnp.float32),
        grid=(m // tm,),
        in_specs=[pl.BlockSpec((tm, di), lambda i: (i, 0)),
                  pl.BlockSpec((dim, di), lambda i: (0, 0))],      # resident bf16 weight
        out_specs=pl.BlockSpec((tm, dim), lambda i: (i, 0)),
        compiler_params=pltpu.CompilerParams(
            dimension_semantics=("parallel",), vmem_limit_bytes=_VMEM_LIMIT),
    )(x2d, wo_n)


# ---------------------------------------------------------------------------
# Full forward: no HBM transposes anywhere (only free reshapes / cheap pads).
# ---------------------------------------------------------------------------
def attention_forward(x, params, *, heads, dim_head, tq=None, tk=None, proj_tm=None):
    b, n, dim = x.shape
    di = heads * dim_head

    # one-shot weight prep (hoisted l2norm + bf16 cast). In a real model this would be
    # computed once and cached across steps / layers.
    wqkv = jnp.concatenate([params["wq"], params["wk"], params["wv"]], axis=0)
    wqkv_n = l2norm_rows_bf16(wqkv)                      # (3*di, dim) bf16
    wo_n = l2norm_cols_bf16(params["wo"])                # (dim, di)  bf16

    # learned per-(head, dim_head) scales, lane-dense; 1/sqrt(dh) folded into q scale
    qs = (params["q_scale"] * dim_head ** -0.5).reshape(1, di)
    ks = params["k_scale"].reshape(1, di)
    qk_scale = jnp.concatenate([qs, ks], axis=1).astype(jnp.float32)   # (1, 2*di)

    # tiles + sequence padding (padded kv positions are masked inside the kernel)
    tq = tq or _attn_seq_tile(n, _ATTN_TQ_CAP)
    tk = tk or _attn_seq_tile(n, _ATTN_TK_CAP)
    step = tq * tk // math.gcd(tq, tk)
    n_pad = ((n + step - 1) // step) * step
    if n_pad != n:
        x = jnp.pad(x, ((0, 0), (0, n_pad - n), (0, 0)))

    m = b * n_pad
    tm = proj_tm or _pick_tile(m, _PROJ_TM_CAP)

    # fused q/k/v projection + per-head l2norm/scale, lane-dense bf16 output
    x2d = _pad_rows(x.reshape(m, dim), tm)
    qkv2d = qkv_project(x2d, wqkv_n, qk_scale, heads=heads, dim_head=dim_head, tm=tm)
    qkv = qkv2d[:m].reshape(b, n_pad, 3 * di)

    # flash attention over the pre-normalized bf16 q/k/v
    out = flash_attention(qkv, heads=heads, dim_head=dim_head, tq=tq, tk=tk, n_actual=n)

    # output NormLinear
    # TODO(synk): attention-weight dropout not implemented (module default p=0.0).
    o2d = _pad_rows(out.reshape(m, di), tm)
    y2d = out_project(o2d, wo_n, tm=tm)
    return y2d[:m].reshape(b, n_pad, dim)[:, :n]


# ---------------------------------------------------------------------------
# Pure-JAX f32 reference (mirrors the PyTorch forward) for validation
# ---------------------------------------------------------------------------
def reference_forward(x, params, *, heads, dim_head):
    def l2n(t, axis=-1):
        return t / jnp.maximum(jnp.sqrt(jnp.sum(t * t, axis=axis, keepdims=True)), EPS)

    b, n, _ = x.shape
    q = x @ l2n(params["wq"], -1).T
    k = x @ l2n(params["wk"], -1).T
    v = x @ l2n(params["wv"], -1).T

    def split(t):
        return t.reshape(b, n, heads, dim_head).transpose(0, 2, 1, 3)

    q, k, v = split(q), split(k), split(v)
    q = l2n(q) * params["q_scale"][None]
    k = l2n(k) * params["k_scale"][None]
    scores = jnp.einsum("bhnd,bhmd->bhnm", q, k) / math.sqrt(dim_head)
    p = jax.nn.softmax(scores, axis=-1)
    o = jnp.einsum("bhnm,bhmd->bhnd", p, v)
    o = o.transpose(0, 2, 1, 3).reshape(b, n, heads * dim_head)
    return o @ l2n(params["wo"], 0).T


# ---------------------------------------------------------------------------
if __name__ == "__main__":
    HEADS, DIM_HEAD, DIM = 4, 8, 32
    DIM_INNER = HEADS * DIM_HEAD

    key = jax.random.PRNGKey(0)
    kx1, kx2, kwq, kwk, kwv, kwo, kqs, kks = jax.random.split(key, 8)

    params = {
        "wq": jax.random.normal(kwq, (DIM_INNER, DIM), jnp.float32) * 0.1,
        "wk": jax.random.normal(kwk, (DIM_INNER, DIM), jnp.float32) * 0.1,
        "wv": jax.random.normal(kwv, (DIM_INNER, DIM), jnp.float32) * 0.1,
        "wo": jax.random.normal(kwo, (DIM, DIM_INNER), jnp.float32) * 0.1,
        # nn.Parameter(torch.ones(heads, 1, dim_head) * dim_head ** 0.25), mildly
        # perturbed so the per-(head, dim) scale plumbing is actually exercised.
        "q_scale": (DIM_HEAD ** 0.25)
        * (1.0 + 0.05 * jax.random.normal(kqs, (HEADS, 1, DIM_HEAD), jnp.float32)),
        "k_scale": (DIM_HEAD ** 0.25)
        * (1.0 + 0.05 * jax.random.normal(kks, (HEADS, 1, DIM_HEAD), jnp.float32)),
    }

    def check(x, out, tag):
        ref = reference_forward(x, params, heads=HEADS, dim_head=DIM_HEAD)
        assert out.shape == ref.shape, (tag, out.shape, ref.shape)
        max_err = float(jnp.max(jnp.abs(out - ref)))
        # bf16 MXU inputs / bf16 activation streams with f32 accumulation
        assert jnp.allclose(out, ref, atol=3e-2, rtol=3e-2), (
            f"{tag}: mismatch vs reference, max abs err {max_err}")

    # case 1: tiny tiles force multi-step online softmax and a multi-tile projection grid
    x1 = jax.random.normal(kx1, (2, 16, DIM), jnp.float32)
    out1 = jax.block_until_ready(attention_forward(
        x1, params, heads=HEADS, dim_head=DIM_HEAD, tq=8, tk=8, proj_tm=16))
    check(x1, out1, "case1")

    # case 2: N=12 not divisible by the tile -> exercises the pad + kv-mask path
    x2 = jax.random.normal(kx2, (2, 12, DIM), jnp.float32)
    out2 = jax.block_until_ready(attention_forward(
        x2, params, heads=HEADS, dim_head=DIM_HEAD, tq=8, tk=8))
    check(x2, out2, "case2")

    print("KERNEL_OK")
</pallas_src>

<mosaic_0001>
module attributes {stable_mosaic.version = 11 : i64} {
  func.func @_row_l2norm_bf16_kernel(%arg0: i32, %arg1: memref<32x32xf32, #tpu.memory_space<vmem>>, %arg2: memref<32x32xbf16, #tpu.memory_space<vmem>>) attributes {dimension_semantics = [#tpu.dimension_semantics<parallel>], iteration_bounds = array<i64: 3>, scalar_prefetch = 0 : i64, scratch_operands = 0 : i64, tpu.core_type = #tpu.core_type<tc>, window_params = [{transform_indices = @transform_0, window_bounds = array<i64: 32, 32>}, {transform_indices = @transform_1, window_bounds = array<i64: 32, 32>}]} {
    %c0 = arith.constant 0 : index
    %c0_0 = arith.constant 0 : index
    %0 = vector.load %arg1[%c0, %c0_0] : memref<32x32xf32, #tpu.memory_space<vmem>>, vector<32x32xf32>
    %1 = arith.mulf %0, %0 : vector<32x32xf32>
    %cst = arith.constant dense<0.000000e+00> : vector<32xf32>
    %2 = vector.multi_reduction <add>, %1, %cst [1] : vector<32x32xf32> to vector<32xf32>
    %3 = vector.shape_cast %2 : vector<32xf32> to vector<32x1xf32>
    %cst_1 = arith.constant 1.000000e-24 : f32
    %4 = vector.broadcast %cst_1 : f32 to vector<32x1xf32>
    %5 = arith.maximumf %3, %4 : vector<32x1xf32>
    %6 = math.rsqrt %5 : vector<32x1xf32>
    %7 = vector.broadcast %6 : vector<32x1xf32> to vector<32x32xf32>
    %8 = arith.mulf %0, %7 : vector<32x32xf32>
    %9 = arith.truncf %8 : vector<32x32xf32> to vector<32x32xbf16>
    %c0_2 = arith.constant 0 : index
    %c0_3 = arith.constant 0 : index
    %10 = vector.load %arg2[%c0_2, %c0_3] : memref<32x32xbf16, #tpu.memory_space<vmem>>, vector<32x32xbf16>
    tpu.vector_store %arg2[%c0_2, %c0_3], %9 {strides = array<i32>} : memref<32x32xbf16, #tpu.memory_space<vmem>>, vector<32x32xbf16>,
    return
  }
  func.func @transform_0(%arg0: i32) -> (i32, i32) {
    %c0_i32 = arith.constant 0 : i32
    %c0_i32_0 = arith.constant 0 : i32
    return %arg0, %c0_i32 : i32, i32
  }
  func.func @transform_1(%arg0: i32) -> (i32, i32) {
    %c0_i32 = arith.constant 0 : i32
    %c0_i32_0 = arith.constant 0 : i32
    return %arg0, %c0_i32 : i32, i32
  }
}

</mosaic_0001>

<bundles_post_ra>
// kernel: tpu_custom_call.1
= control target key start
LH: loop header
LB: loop body
LE: loop exit
PB: predicated region body
PF: predicated region fallthrough
CT: control target
= control target key end

     0   :  { %s283_s6 = smov 0   ;;  %s304_s0 = inlined_call_operand.vmem [shape: f32[96,32], index: 0, kind: input, shape index: {}]   ;;  %s305_s1 = inlined_call_operand.vmem [shape: bf16[96,32], index: 1, kind: output, shape index: {}]  }
   0x1 LB: > { %s230_s7 = sadd.s32 4294967295, %s271_s6   ;;  %p234_p0 = scmp.ge.s32.totalorder %s271_s6, 1  ;;  %s271_s6 = sphi %s283_s6, %s11_s6  }
   0x2   : > { %p88_p1 = scmp.lt.s32.totalorder %s271_s6, 4 }
   0x4   : > { %p89_p2 = pnand %p234_p0, %p88_p1 }
   0x5   : > { %s235_s8 = sshll.u32 (!%p89_p2), %s230_s7, 2  ;;  %vm128_vm0 = vcmask (!%p89_p2), 261120   ;;  %vm169_vm1 = vcmask (!%p89_p2), 257024  }
   0x6   : > { %92 = sbr.rel (%p89_p2) target bundleno = 185 (0xb9), region = 24  ;;  %p109_p3 = scmp.lt.s32.totalorder (!%p89_p2), %s235_s8, 11 }
   0xd   : > { %s307_s8 = smov (!%p109_p3, %s235_s8), 11 }
   0xe   : > { %s236_s9 = sshll.u32 %s307_s8, 3  ;;  %s238_s13 = sshll.u32 %s307_s8, 2 }
   0xf   : > { %s112_s12 = scalar_lea.vmem %s304_s0, %s236_s9  ;;  %s118_s16 = scalar_lea.vmem %s305_s1, %s238_s13 }
  0x10   : > { %v122_v0 = vld [vmem:[%s112_s12 + $0x10] sm:$0xff]  ;;  %v120_v1 = vld [vmem:[%s112_s12] sm:$0xff]  ;;  %v123_v2 = vld [vmem:[%s112_s12 + $0x18] sm:$0xff] }
  0x11   : > { %v126_v3 = vmul.f32 %v122_v0, %v122_v0  ;;  %v124_v4 = vmul.f32 %v120_v1, %v120_v1  ;;  %v127_v5 = vmul.f32 %v123_v2, %v123_v2  ;;  %v121_v6 = vld [vmem:[%s112_s12 + $0x8] sm:$0xff] }
  0x12   : > { %v125_v7 = vmul.f32 %v121_v6, %v121_v6 }
  0x13   : > { %v135_v8 = vsel %vm128_vm0, %v126_v3, 0.0  ;;  %v129_v9 = vsel %vm128_vm0, %v124_v4, 0.0  ;;  %v138_v10 = vsel %vm128_vm0, %v127_v5, 0.0 }
  0x14   : > { %136 = vadd.xlane.f32.xlu1 %v135_v8  ;;  %130 = vadd.xlane.f32.xlu0 %v129_v9  ;;  %v132_v11 = vsel %vm128_vm0, %v125_v7, 0.0 }
  0x18   : > { %139 = vadd.xlane.f32.xlu1 %v138_v10  ;;  %133 = vadd.xlane.f32.xlu0 %v132_v11 }
  0xa1   : > { %v137_v12 = vpop.xlane.xlu1 %136  ;;  %v131_v13 = vpop.xlane.xlu0 %130 }
  0xa2   : > { %v143_v14 = vmax.f32 %v137_v12, 1e-24  ;;  %v141_v15 = vmax.f32 %v131_v13, 1e-24 }
  0xa4   : > { %257 = vrsqrt.f32 %v143_v14 }
  0xa5   : > { %259 = vrsqrt.f32 %v141_v15  ;;  %v140_v16 = vpop.xlane.xlu1 %139  ;;  %v134_v17 = vpop.xlane.xlu0 %133 }
  0xa6   : > { %v144_v18 = vmax.f32 %v140_v16, 1e-24  ;;  %v142_v19 = vmax.f32 %v134_v17, 1e-24 }
  0xa8   : > { %261 = vrsqrt.f32 %v144_v18 }
  0xa9   : > { %263 = vrsqrt.f32 %v142_v19 }
  0xae   : > { %v258_v20 = vpop.eup %257 }
  0xaf   : > { %v260_v21 = vpop.eup %259  ;;  %v151_v22 = vmul.f32 %v258_v20, %v122_v0 }
  0xb0   : > { %v149_v23 = vmul.f32 %v260_v21, %v120_v1 }
  0xb1   : > { %v247_v24 = vpack.c.bf16 %v151_v22, %v151_v22 }
  0xb2   : > { %v262_v25 = vpop.eup %261  ;;  %v245_v26 = vpack.c.bf16 %v149_v23, %v149_v23 }
  0xb3   : > { %v264_v27 = vpop.eup %263  ;;  %172 = vst.msk [vmem:[%s118_s16 + $0x8] sm:$0xf] %vm169_vm1, %v247_v24  ;;  %v152_v28 = vmul.f32 %v262_v25, %v123_v2 }
  0xb4   : > { %170 = vst.msk [vmem:[%s118_s16] sm:$0xf] %vm169_vm1, %v245_v26  ;;  %v150_v29 = vmul.f32 %v264_v27, %v121_v6 }
  0xb5   : > { %v248_v30 = vpack.c.bf16 %v152_v28, %v152_v28 }
  0xb6   : > { %v246_v31 = vpack.c.bf16 %v150_v29, %v150_v29 }
  0xb7   : > { %173 = vst.msk [vmem:[%s118_s16 + $0xc] sm:$0xf] %vm169_vm1, %v248_v30 }
  0xb8   : > { %171 = vst.msk [vmem:[%s118_s16 + $0x4] sm:$0xf] %vm169_vm1, %v246_v31 }
  0xb9 PF: > { %s11_s6 = sadd.s32 1, %s271_s6  }
  0xba   : > { %p8_p4 = scmp.ge.s32.totalorder %s11_s6, 5  }
  0xbc   :  { %10 = sbr.rel (!%p8_p4) target bundleno = 1 (0x1), region = 54 }

</bundles_post_ra>
